<compile_context>
chip_gen: v6e
topology: v6e:2x2x1
jax: 0.10.0
libtpu: 0.0.40
codegen_flags: <defaults>
</compile_context>

<pallas_src>
import functools
import math

import jax
import jax.numpy as jnp
from jax.experimental import pallas as pl
from jax.experimental.pallas import tpu as pltpu


# ----------------------------- Pallas kernel --------------------------------

def _layer_norm(x, gamma, beta, eps=1e-5):
    # x: (S, D), gamma/beta: (1, D)   -- matches torch.nn.LayerNorm(d_model)
    mean = jnp.mean(x, axis=-1, keepdims=True)
    var = jnp.mean((x - mean) ** 2, axis=-1, keepdims=True)
    return (x - mean) * jax.lax.rsqrt(var + eps) * gamma + beta


def encoder_layer_kernel(x_ref, mask_ref, wqk_ref, wvo_ref, w12_ref, ln_ref,
                         y_ref, attn_ref, *, n_heads, d_k, d_v):
    """One full encoder layer for one batch element.

    Host-fused weight refs:
      wqk : (2H, D, d_k) bf16  -- [W_Q per head ; W_K per head]
      wvo : (2H, D, d_v) bf16  -- [W_V per head ; W_O^T per head]
      w12 : (2, D, d_ff) bf16  -- [W1 ; W2^T]
      ln  : (4, D)       f32   -- [gamma1; beta1; gamma2; beta2]
    """
    H = n_heads
    x = x_ref[0]                        # (S, D) f32
    S, D = x.shape
    mask_add = mask_ref[...]            # (1, 1, S) additive key-pad mask (0 / -1e9)

    x16 = x.astype(jnp.bfloat16)
    xb = jnp.broadcast_to(x16, (2 * H, S, D))   # hoisted once, reused for Q/K and V

    wqk = wqk_ref[...]                  # (2H, D, d_k) bf16
    wvo = wvo_ref[...]                  # (2H, D, d_v) bf16

    # ---- fused Q/K projections: single batched matmul over 2H "heads" -------
    qk = jax.lax.dot_general(
        xb, wqk,
        dimension_numbers=(((2,), (1,)), ((0,), (0,))),
        preferred_element_type=jnp.float32)       # (2H, S, d_k)
    q, k = qk[:H], qk[H:]                         # major-dim slices (no relayout)

    # ---- V projection, batched over H heads ----------------------------------
    v = jax.lax.dot_general(
        xb[:H], wvo[:H],
        dimension_numbers=(((2,), (1,)), ((0,), (0,))),
        preferred_element_type=jnp.float32)       # (H, S, d_v)

    # ---- scaled dot-product attention, all heads in one dot_general ----------
    # contract the last dims of q and k directly (no explicit transpose).
    scores = jax.lax.dot_general(
        q.astype(jnp.bfloat16), k.astype(jnp.bfloat16),
        dimension_numbers=(((2,), (2,)), ((0,), (0,))),
        preferred_element_type=jnp.float32)       # (H, S, S)
    scores = scores * (1.0 / math.sqrt(d_k)) + mask_add

    m = jnp.max(scores, axis=-1, keepdims=True)
    e = jnp.exp(scores - m)
    denom = jnp.sum(e, axis=-1, keepdims=True)
    attn = e * pl.reciprocal(denom, approx=True)  # softmax via EUP reciprocal
    attn_ref[0] = attn                            # one store for all heads
    # TODO(synk): attn last dim (=S) < 128 lanes -> masked partial store; pad the
    # key dim to a multiple of 128 (or skip emitting the map) past toy sizes.

    # ---- context + output projection, batched over heads ---------------------
    ctx = jax.lax.dot_general(
        attn.astype(jnp.bfloat16), v.astype(jnp.bfloat16),
        dimension_numbers=(((2,), (1,)), ((0,), (0,))),
        preferred_element_type=jnp.float32)       # (H, S, d_v)
    proj = jax.lax.dot_general(
        ctx.astype(jnp.bfloat16), wvo[H:],        # W_O^T per head: contract d_v dims
        dimension_numbers=(((2,), (2,)), ((0,), (0,))),
        preferred_element_type=jnp.float32)       # (H, S, D)
    attn_out = jnp.sum(proj, axis=0)              # concat-free head merge (major-dim sum)

    ln = ln_ref[...]                              # (4, D) f32
    h1 = _layer_norm(attn_out + x, ln[0:1], ln[1:2])

    # ---- position-wise FFN (Linear -> ReLU -> Linear, bias=False) -------------
    w12 = w12_ref[...]                            # (2, D, d_ff) bf16
    f1 = jnp.maximum(
        jnp.dot(h1.astype(jnp.bfloat16), w12[0],
                preferred_element_type=jnp.float32), 0.0)         # (S, d_ff)
    f2 = jax.lax.dot_general(
        f1.astype(jnp.bfloat16), w12[1],          # W2^T: contract d_ff dims
        dimension_numbers=(((1,), (1,)), ((), ())),
        preferred_element_type=jnp.float32)       # (S, D)
    y_ref[0] = _layer_norm(f2 + h1, ln[2:3], ln[3:4])


def prepare_layer_params(p, *, n_heads, d_k, d_v):
    """Rearrange/fuse the natural-layout weights into the kernel layout."""
    D = p["wq"].shape[0]
    wq_h = p["wq"].reshape(D, n_heads, d_k).transpose(1, 0, 2)    # (H, D, d_k)
    wk_h = p["wk"].reshape(D, n_heads, d_k).transpose(1, 0, 2)    # (H, D, d_k)
    wv_h = p["wv"].reshape(D, n_heads, d_v).transpose(1, 0, 2)    # (H, D, d_v)
    wo_t = p["wo"].reshape(n_heads, d_v, D).transpose(0, 2, 1)    # (H, D, d_v)
    wqk = jnp.concatenate([wq_h, wk_h], axis=0).astype(jnp.bfloat16)   # (2H, D, d_k)
    wvo = jnp.concatenate([wv_h, wo_t], axis=0).astype(jnp.bfloat16)   # (2H, D, d_v)
    w12 = jnp.stack([p["w1"], p["w2"].T], axis=0).astype(jnp.bfloat16) # (2, D, d_ff)
    ln = jnp.concatenate([p["g1"], p["b1"], p["g2"], p["b2"]], axis=0) # (4, D) f32
    return wqk, wvo, w12, ln


def encoder_layer_pallas(x, mask_add, wqk, wvo, w12, ln, *, n_heads, d_k, d_v):
    B, S, D = x.shape
    H = n_heads
    d_ff = w12.shape[-1]
    kernel = functools.partial(encoder_layer_kernel,
                               n_heads=H, d_k=d_k, d_v=d_v)
    wfull3 = lambda b: (0, 0, 0)
    y, attn = pl.pallas_call(
        kernel,
        out_shape=(jax.ShapeDtypeStruct((B, S, D), jnp.float32),
                   jax.ShapeDtypeStruct((B, H, S, S), jnp.float32)),
        grid=(B,),
        in_specs=[
            pl.BlockSpec((1, S, D), lambda b: (b, 0, 0)),      # x
            pl.BlockSpec((1, 1, S), lambda b: (b, 0, 0)),      # additive pad mask
            pl.BlockSpec((2 * H, D, d_k), wfull3),             # fused W_Q | W_K
            pl.BlockSpec((2 * H, D, d_v), wfull3),             # fused W_V | W_O^T
            pl.BlockSpec((2, D, d_ff), wfull3),                # fused W1 | W2^T
            pl.BlockSpec((4, D), lambda b: (0, 0)),            # LN gamma/beta (x2)
        ],
        out_specs=(pl.BlockSpec((1, S, D), lambda b: (b, 0, 0)),
                   pl.BlockSpec((1, H, S, S), lambda b: (b, 0, 0, 0))),
        compiler_params=pltpu.CompilerParams(
            dimension_semantics=("parallel",)),   # B>=2 steps -> both v7x TCs used
    )(x, mask_add, wqk, wvo, w12, ln)
    return y, attn


# ------------------------------ JAX glue -------------------------------------

def sinusoidal_pe(max_len, d_model):
    pos = jnp.arange(max_len, dtype=jnp.float32)[:, None]
    div = jnp.exp(jnp.arange(0, d_model, 2, dtype=jnp.float32)
                  * (-math.log(10000.0) / d_model))
    pe = jnp.zeros((max_len, d_model), dtype=jnp.float32)
    pe = pe.at[:, 0::2].set(jnp.sin(pos * div))
    pe = pe.at[:, 1::2].set(jnp.cos(pos * div))
    return pe


def init_params(key, *, src_vocab_size, n_layers, n_heads, d_k, d_v, d_model, d_ff,
                max_len=64):
    keys = jax.random.split(key, 1 + 6 * n_layers)
    params = {
        "emb": jax.random.normal(keys[0], (src_vocab_size, d_model), jnp.float32),
        "pe": sinusoidal_pe(max_len, d_model),
        "layers": [],
    }
    scale = 0.1
    for l in range(n_layers):
        k = jax.random.split(keys[1 + l], 6)
        params["layers"].append({
            "wq": scale * jax.random.normal(k[0], (d_model, n_heads * d_k), jnp.float32),
            "wk": scale * jax.random.normal(k[1], (d_model, n_heads * d_k), jnp.float32),
            "wv": scale * jax.random.normal(k[2], (d_model, n_heads * d_v), jnp.float32),
            "wo": scale * jax.random.normal(k[3], (n_heads * d_v, d_model), jnp.float32),
            "w1": scale * jax.random.normal(k[4], (d_model, d_ff), jnp.float32),
            "w2": scale * jax.random.normal(k[5], (d_ff, d_model), jnp.float32),
            "g1": jnp.ones((1, d_model), jnp.float32),
            "b1": jnp.zeros((1, d_model), jnp.float32),
            "g2": jnp.ones((1, d_model), jnp.float32),
            "b2": jnp.zeros((1, d_model), jnp.float32),
        })
    return params


def encoder_forward(enc_inputs, params, *, n_heads, d_k, d_v):
    # enc_inputs: [batch, src_len] int32; token id 0 == PAD
    B, S = enc_inputs.shape
    x = jnp.take(params["emb"], enc_inputs, axis=0)            # src_emb
    x = x + params["pe"][:S][None, :, :]                       # pos_emb
    # TODO(synk): PositionalEncoding dropout is omitted (eval-mode identity).
    # Additive pad mask hoisted out of the kernel: -1e9 where the key is PAD.
    mask_add = jnp.where(enc_inputs == 0, -1e9, 0.0).astype(jnp.float32)[:, None, :]
    attns = []
    for lp in params["layers"]:
        wqk, wvo, w12, ln = prepare_layer_params(lp, n_heads=n_heads, d_k=d_k, d_v=d_v)
        x, attn = encoder_layer_pallas(x, mask_add, wqk, wvo, w12, ln,
                                       n_heads=n_heads, d_k=d_k, d_v=d_v)
        attns.append(attn)
    return x, attns


# ------------------------- pure-JAX reference check --------------------------

def _mm_bf16(a, b):
    return jnp.dot(a.astype(jnp.bfloat16), b.astype(jnp.bfloat16),
                   preferred_element_type=jnp.float32)


def _ref_forward(enc_inputs, params, *, n_heads, d_k, d_v):
    # Same semantics as the PyTorch Encoder, with matching bf16 matmul inputs.
    bf = lambda a: a.astype(jnp.bfloat16)
    B, S = enc_inputs.shape
    x = jnp.take(params["emb"], enc_inputs, axis=0) + params["pe"][:S][None]
    pad = (enc_inputs == 0)[:, None, None, :]                  # (B,1,1,S)
    attns = []
    for p in params["layers"]:
        q = _mm_bf16(x, p["wq"]).reshape(B, S, n_heads, d_k).transpose(0, 2, 1, 3)
        k = _mm_bf16(x, p["wk"]).reshape(B, S, n_heads, d_k).transpose(0, 2, 1, 3)
        v = _mm_bf16(x, p["wv"]).reshape(B, S, n_heads, d_v).transpose(0, 2, 1, 3)
        s = jnp.einsum("bhqd,bhkd->bhqk", bf(q), bf(k),
                       preferred_element_type=jnp.float32) / jnp.sqrt(jnp.float32(d_k))
        s = jnp.where(pad, -1e9, s)
        a = jax.nn.softmax(s, axis=-1)
        ctx = jnp.einsum("bhqk,bhkd->bhqd", bf(a), bf(v),
                         preferred_element_type=jnp.float32)
        ctx = ctx.transpose(0, 2, 1, 3).reshape(B, S, -1)
        h1 = _mm_bf16(ctx, p["wo"]) + x
        mu = h1.mean(-1, keepdims=True); var = ((h1 - mu) ** 2).mean(-1, keepdims=True)
        h1 = (h1 - mu) / jnp.sqrt(var + 1e-5) * p["g1"][0] + p["b1"][0]
        ff = _mm_bf16(jnp.maximum(_mm_bf16(h1, p["w1"]), 0.0), p["w2"]) + h1
        mu = ff.mean(-1, keepdims=True); var = ((ff - mu) ** 2).mean(-1, keepdims=True)
        x = (ff - mu) / jnp.sqrt(var + 1e-5) * p["g2"][0] + p["b2"][0]
        attns.append(a)
    return x, attns


# ---------------------------------- main --------------------------------------

if __name__ == "__main__":
    src_vocab_size, n_layers, n_heads = 16, 2, 2
    d_k = d_v = 16
    d_model, d_ff = 32, 64
    B, S = 2, 8

    key = jax.random.PRNGKey(0)
    params = init_params(key, src_vocab_size=src_vocab_size, n_layers=n_layers,
                         n_heads=n_heads, d_k=d_k, d_v=d_v,
                         d_model=d_model, d_ff=d_ff, max_len=S)

    tok_key = jax.random.fold_in(key, 123)
    enc_inputs = jax.random.randint(tok_key, (B, S), 1, src_vocab_size, dtype=jnp.int32)
    enc_inputs = enc_inputs.at[:, -2:].set(0)   # trailing PAD tokens

    out, attns = encoder_forward(enc_inputs, params,
                                 n_heads=n_heads, d_k=d_k, d_v=d_v)
    out = jax.block_until_ready(out)
    attns = [jax.block_until_ready(a) for a in attns]

    ref_out, ref_attns = _ref_forward(enc_inputs, params,
                                      n_heads=n_heads, d_k=d_k, d_v=d_v)
    assert out.shape == (B, S, d_model)
    assert all(a.shape == (B, n_heads, S, S) for a in attns)
    # bf16 matmul inputs + approx reciprocal in softmax -> loosened tolerance
    assert jnp.allclose(out, ref_out, atol=1e-2, rtol=1e-2)
    assert all(jnp.allclose(a, r, atol=1e-2, rtol=1e-2)
               for a, r in zip(attns, ref_attns))

    print("KERNEL_OK")
</pallas_src>

<mosaic_0001>
module attributes {stable_mosaic.version = 11 : i64} {
  func.func @encoder_layer_kernel(%arg0: i32, %arg1: memref<1x8x32xf32, #tpu.memory_space<vmem>>, %arg2: memref<1x1x8xf32, #tpu.memory_space<vmem>>, %arg3: memref<4x32x16xbf16, #tpu.memory_space<vmem>>, %arg4: memref<4x32x16xbf16, #tpu.memory_space<vmem>>, %arg5: memref<2x32x64xbf16, #tpu.memory_space<vmem>>, %arg6: memref<4x32xf32, #tpu.memory_space<vmem>>, %arg7: memref<1x8x32xf32, #tpu.memory_space<vmem>>, %arg8: memref<1x2x8x8xf32, #tpu.memory_space<vmem>>) attributes {dimension_semantics = [#tpu.dimension_semantics<parallel>], iteration_bounds = array<i64: 2>, scalar_prefetch = 0 : i64, scratch_operands = 0 : i64, tpu.core_type = #tpu.core_type<tc>, window_params = [{transform_indices = @transform_0, window_bounds = array<i64: 1, 8, 32>}, {transform_indices = @transform_1, window_bounds = array<i64: 1, 1, 8>}, {pipeline_mode = #tpu.pipeline_mode<synchronous>, transform_indices = @transform_2, window_bounds = array<i64: 4, 32, 16>}, {pipeline_mode = #tpu.pipeline_mode<synchronous>, transform_indices = @transform_3, window_bounds = array<i64: 4, 32, 16>}, {pipeline_mode = #tpu.pipeline_mode<synchronous>, transform_indices = @transform_4, window_bounds = array<i64: 2, 32, 64>}, {pipeline_mode = #tpu.pipeline_mode<synchronous>, transform_indices = @transform_5, window_bounds = array<i64: 4, 32>}, {transform_indices = @transform_6, window_bounds = array<i64: 1, 8, 32>}, {transform_indices = @transform_7, window_bounds = array<i64: 1, 2, 8, 8>}]} {
    %c0 = arith.constant 0 : index
    %c0_0 = arith.constant 0 : index
    %c0_1 = arith.constant 0 : index
    %0 = vector.load %arg1[%c0, %c0_0, %c0_1] : memref<1x8x32xf32, #tpu.memory_space<vmem>>, vector<1x8x32xf32>
    %1 = vector.shape_cast %0 : vector<1x8x32xf32> to vector<8x32xf32>
    %c0_2 = arith.constant 0 : index
    %c0_3 = arith.constant 0 : index
    %c0_4 = arith.constant 0 : index
    %2 = vector.load %arg2[%c0_2, %c0_3, %c0_4] : memref<1x1x8xf32, #tpu.memory_space<vmem>>, vector<1x1x8xf32>
    %3 = arith.truncf %1 : vector<8x32xf32> to vector<8x32xbf16>
    %4 = vector.shape_cast %3 : vector<8x32xbf16> to vector<1x8x32xbf16>
    %5 = vector.broadcast %4 : vector<1x8x32xbf16> to vector<4x8x32xbf16>
    %c0_5 = arith.constant 0 : index
    %c0_6 = arith.constant 0 : index
    %c0_7 = arith.constant 0 : index
    %6 = vector.load %arg3[%c0_5, %c0_6, %c0_7] : memref<4x32x16xbf16, #tpu.memory_space<vmem>>, vector<4x32x16xbf16>
    %c0_8 = arith.constant 0 : index
    %c0_9 = arith.constant 0 : index
    %c0_10 = arith.constant 0 : index
    %7 = vector.load %arg4[%c0_8, %c0_9, %c0_10] : memref<4x32x16xbf16, #tpu.memory_space<vmem>>, vector<4x32x16xbf16>
    %cst = arith.constant dense<0.000000e+00> : vector<4x8x16xf32>
    %8 = tpu.matmul %5, %6, %cst {dimension_numbers = #tpu.dot_dimension_numbers<[2], [1], [1], [2], [0, 0, 0, 1, 1, 2], [0], [0]>} : vector<4x8x32xbf16>, vector<4x32x16xbf16>, vector<4x8x16xf32> -> vector<4x8x16xf32>
    %9 = vector.extract_strided_slice %8 {offsets = [0, 0, 0], sizes = [2, 8, 16], strides = [1, 1, 1]} : vector<4x8x16xf32> to vector<2x8x16xf32>
    %10 = vector.extract_strided_slice %8 {offsets = [2, 0, 0], sizes = [2, 8, 16], strides = [1, 1, 1]} : vector<4x8x16xf32> to vector<2x8x16xf32>
    %11 = vector.extract_strided_slice %5 {offsets = [0, 0, 0], sizes = [2, 8, 32], strides = [1, 1, 1]} : vector<4x8x32xbf16> to vector<2x8x32xbf16>
    %12 = vector.extract_strided_slice %7 {offsets = [0, 0, 0], sizes = [2, 32, 16], strides = [1, 1, 1]} : vector<4x32x16xbf16> to vector<2x32x16xbf16>
    %cst_11 = arith.constant dense<0.000000e+00> : vector<2x8x16xf32>
    %13 = tpu.matmul %11, %12, %cst_11 {dimension_numbers = #tpu.dot_dimension_numbers<[2], [1], [1], [2], [0, 0, 0, 1, 1, 2], [0], [0]>} : vector<2x8x32xbf16>, vector<2x32x16xbf16>, vector<2x8x16xf32> -> vector<2x8x16xf32>
    %14 = arith.truncf %9 : vector<2x8x16xf32> to vector<2x8x16xbf16>
    %15 = arith.truncf %10 : vector<2x8x16xf32> to vector<2x8x16xbf16>
    %cst_12 = arith.constant dense<0.000000e+00> : vector<2x8x8xf32>
    %16 = tpu.matmul %14, %15, %cst_12 {dimension_numbers = #tpu.dot_dimension_numbers<[2], [2], [1], [1], [0, 0, 0, 1, 1, 1], [0], [0]>} : vector<2x8x16xbf16>, vector<2x8x16xbf16>, vector<2x8x8xf32> -> vector<2x8x8xf32>
    %cst_13 = arith.constant 2.500000e-01 : f32
    %17 = vector.broadcast %cst_13 : f32 to vector<2x8x8xf32>
    %18 = arith.mulf %16, %17 : vector<2x8x8xf32>
    %19 = vector.broadcast %2 : vector<1x1x8xf32> to vector<2x8x8xf32>
    %20 = arith.addf %18, %19 : vector<2x8x8xf32>
    %cst_14 = arith.constant dense<0xFF800000> : vector<2x8xf32>
    %21 = vector.multi_reduction <maximumf>, %20, %cst_14 [2] : vector<2x8x8xf32> to vector<2x8xf32>
    %22 = vector.shape_cast %21 : vector<2x8xf32> to vector<2x8x1xf32>
    %23 = vector.broadcast %22 : vector<2x8x1xf32> to vector<2x8x8xf32>
    %24 = arith.subf %20, %23 : vector<2x8x8xf32>
    %25 = math.exp %24 : vector<2x8x8xf32>
    %cst_15 = arith.constant dense<0.000000e+00> : vector<2x8xf32>
    %26 = vector.multi_reduction <add>, %25, %cst_15 [2] : vector<2x8x8xf32> to vector<2x8xf32>
    %27 = vector.shape_cast %26 : vector<2x8xf32> to vector<2x8x1xf32>
    %28 = tpu.reciprocal %27 {approx = true} : vector<2x8x1xf32> -> vector<2x8x1xf32>
    %29 = vector.broadcast %28 : vector<2x8x1xf32> to vector<2x8x8xf32>
    %30 = arith.mulf %25, %29 : vector<2x8x8xf32>
    %c0_16 = arith.constant 0 : index
    %c0_17 = arith.constant 0 : index
    %c0_18 = arith.constant 0 : index
    %c0_19 = arith.constant 0 : index
    %31 = vector.load %arg8[%c0_16, %c0_17, %c0_18, %c0_19] : memref<1x2x8x8xf32, #tpu.memory_space<vmem>>, vector<1x2x8x8xf32>
    %32 = vector.shape_cast %31 : vector<1x2x8x8xf32> to vector<2x8x8xf32>
    %33 = vector.shape_cast %30 : vector<2x8x8xf32> to vector<1x2x8x8xf32>
    tpu.vector_store %arg8[%c0_16, %c0_17, %c0_18, %c0_19], %33 {strides = array<i32>} : memref<1x2x8x8xf32, #tpu.memory_space<vmem>>, vector<1x2x8x8xf32>,
    %34 = arith.truncf %30 : vector<2x8x8xf32> to vector<2x8x8xbf16>
    %35 = arith.truncf %13 : vector<2x8x16xf32> to vector<2x8x16xbf16>
    %cst_20 = arith.constant dense<0.000000e+00> : vector<2x8x16xf32>
    %36 = tpu.matmul %34, %35, %cst_20 {dimension_numbers = #tpu.dot_dimension_numbers<[2], [1], [1], [2], [0, 0, 0, 1, 1, 2], [0], [0]>} : vector<2x8x8xbf16>, vector<2x8x16xbf16>, vector<2x8x16xf32> -> vector<2x8x16xf32>
    %37 = arith.truncf %36 : vector<2x8x16xf32> to vector<2x8x16xbf16>
    %38 = vector.extract_strided_slice %7 {offsets = [2, 0, 0], sizes = [2, 32, 16], strides = [1, 1, 1]} : vector<4x32x16xbf16> to vector<2x32x16xbf16>
    %cst_21 = arith.constant dense<0.000000e+00> : vector<2x8x32xf32>
    %39 = tpu.matmul %37, %38, %cst_21 {dimension_numbers = #tpu.dot_dimension_numbers<[2], [2], [1], [1], [0, 0, 0, 1, 1, 1], [0], [0]>} : vector<2x8x16xbf16>, vector<2x32x16xbf16>, vector<2x8x32xf32> -> vector<2x8x32xf32>
    %cst_22 = arith.constant dense<0.000000e+00> : vector<8x32xf32>
    %40 = vector.multi_reduction <add>, %39, %cst_22 [0] : vector<2x8x32xf32> to vector<8x32xf32>
    %c0_23 = arith.constant 0 : index
    %c0_24 = arith.constant 0 : index
    %41 = vector.load %arg6[%c0_23, %c0_24] : memref<4x32xf32, #tpu.memory_space<vmem>>, vector<4x32xf32>
    %42 = arith.addf %40, %1 : vector<8x32xf32>
    %43 = vector.extract_strided_slice %41 {offsets = [0, 0], sizes = [1, 32], strides = [1, 1]} : vector<4x32xf32> to vector<1x32xf32>
    %44 = vector.extract_strided_slice %41 {offsets = [1, 0], sizes = [1, 32], strides = [1, 1]} : vector<4x32xf32> to vector<1x32xf32>
    %cst_25 = arith.constant dense<0.000000e+00> : vector<8xf32>
    %45 = vector.multi_reduction <add>, %42, %cst_25 [1] : vector<8x32xf32> to vector<8xf32>
    %46 = vector.shape_cast %45 : vector<8xf32> to vector<8x1xf32>
    %cst_26 = arith.constant 3.200000e+01 : f32
    %47 = vector.broadcast %cst_26 : f32 to vector<8x1xf32>
    %48 = arith.divf %46, %47 : vector<8x1xf32>
    %49 = vector.broadcast %48 : vector<8x1xf32> to vector<8x32xf32>
    %50 = arith.subf %42, %49 : vector<8x32xf32>
    %51 = arith.mulf %50, %50 : vector<8x32xf32>
    %cst_27 = arith.constant dense<0.000000e+00> : vector<8xf32>
    %52 = vector.multi_reduction <add>, %51, %cst_27 [1] : vector<8x32xf32> to vector<8xf32>
    %53 = vector.shape_cast %52 : vector<8xf32> to vector<8x1xf32>
    %cst_28 = arith.constant 3.200000e+01 : f32
    %54 = vector.broadcast %cst_28 : f32 to vector<8x1xf32>
    %55 = arith.divf %53, %54 : vector<8x1xf32>
    %56 = vector.broadcast %48 : vector<8x1xf32> to vector<8x32xf32>
    %57 = arith.subf %42, %56 : vector<8x32xf32>
    %cst_29 = arith.constant 9.99999974E-6 : f32
    %58 = vector.broadcast %cst_29 : f32 to vector<8x1xf32>
    %59 = arith.addf %55, %58 : vector<8x1xf32>
    %60 = math.rsqrt %59 : vector<8x1xf32>
    %61 = vector.broadcast %60 : vector<8x1xf32> to vector<8x32xf32>
    %62 = arith.mulf %57, %61 : vector<8x32xf32>
    %63 = vector.broadcast %43 : vector<1x32xf32> to vector<8x32xf32>
    %64 = arith.mulf %62, %63 : vector<8x32xf32>
    %65 = vector.broadcast %44 : vector<1x32xf32> to vector<8x32xf32>
    %66 = arith.addf %64, %65 : vector<8x32xf32>
    %c0_30 = arith.constant 0 : index
    %c0_31 = arith.constant 0 : index
    %c0_32 = arith.constant 0 : index
    %67 = vector.load %arg5[%c0_30, %c0_31, %c0_32] : memref<2x32x64xbf16, #tpu.memory_space<vmem>>, vector<2x32x64xbf16>
    %68 = arith.truncf %66 : vector<8x32xf32> to vector<8x32xbf16>
    %69 = vector.extract_strided_slice %67 {offsets = [0, 0, 0], sizes = [1, 32, 64], strides = [1, 1, 1]} : vector<2x32x64xbf16> to vector<1x32x64xbf16>
    %70 = vector.shape_cast %69 : vector<1x32x64xbf16> to vector<32x64xbf16>
    %cst_33 = arith.constant dense<0.000000e+00> : vector<8x64xf32>
    %71 = tpu.matmul %68, %70, %cst_33 {dimension_numbers = #tpu.dot_dimension_numbers<[1], [0], [0], [1], [0, 0, 1, 1], [], []>} : vector<8x32xbf16>, vector<32x64xbf16>, vector<8x64xf32> -> vector<8x64xf32>
    %cst_34 = arith.constant 0.000000e+00 : f32
    %72 = vector.broadcast %cst_34 : f32 to vector<8x64xf32>
    %73 = arith.maximumf %71, %72 : vector<8x64xf32>
    %74 = arith.truncf %73 : vector<8x64xf32> to vector<8x64xbf16>
    %75 = vector.extract_strided_slice %67 {offsets = [1, 0, 0], sizes = [1, 32, 64], strides = [1, 1, 1]} : vector<2x32x64xbf16> to vector<1x32x64xbf16>
    %76 = vector.shape_cast %75 : vector<1x32x64xbf16> to vector<32x64xbf16>
    %cst_35 = arith.constant dense<0.000000e+00> : vector<8x32xf32>
    %77 = tpu.matmul %74, %76, %cst_35 {dimension_numbers = #tpu.dot_dimension_numbers<[1], [1], [0], [0], [0, 0, 1, 0], [], []>} : vector<8x64xbf16>, vector<32x64xbf16>, vector<8x32xf32> -> vector<8x32xf32>
    %78 = arith.addf %77, %66 : vector<8x32xf32>
    %79 = vector.extract_strided_slice %41 {offsets = [2, 0], sizes = [1, 32], strides = [1, 1]} : vector<4x32xf32> to vector<1x32xf32>
    %80 = vector.extract_strided_slice %41 {offsets = [3, 0], sizes = [1, 32], strides = [1, 1]} : vector<4x32xf32> to vector<1x32xf32>
    %cst_36 = arith.constant dense<0.000000e+00> : vector<8xf32>
    %81 = vector.multi_reduction <add>, %78, %cst_36 [1] : vector<8x32xf32> to vector<8xf32>
    %82 = vector.shape_cast %81 : vector<8xf32> to vector<8x1xf32>
    %cst_37 = arith.constant 3.200000e+01 : f32
    %83 = vector.broadcast %cst_37 : f32 to vector<8x1xf32>
    %84 = arith.divf %82, %83 : vector<8x1xf32>
    %85 = vector.broadcast %84 : vector<8x1xf32> to vector<8x32xf32>
    %86 = arith.subf %78, %85 : vector<8x32xf32>
    %87 = arith.mulf %86, %86 : vector<8x32xf32>
    %cst_38 = arith.constant dense<0.000000e+00> : vector<8xf32>
    %88 = vector.multi_reduction <add>, %87, %cst_38 [1] : vector<8x32xf32> to vector<8xf32>
    %89 = vector.shape_cast %88 : vector<8xf32> to vector<8x1xf32>
    %cst_39 = arith.constant 3.200000e+01 : f32
    %90 = vector.broadcast %cst_39 : f32 to vector<8x1xf32>
    %91 = arith.divf %89, %90 : vector<8x1xf32>
    %92 = vector.broadcast %84 : vector<8x1xf32> to vector<8x32xf32>
    %93 = arith.subf %78, %92 : vector<8x32xf32>
    %cst_40 = arith.constant 9.99999974E-6 : f32
    %94 = vector.broadcast %cst_40 : f32 to vector<8x1xf32>
    %95 = arith.addf %91, %94 : vector<8x1xf32>
    %96 = math.rsqrt %95 : vector<8x1xf32>
    %97 = vector.broadcast %96 : vector<8x1xf32> to vector<8x32xf32>
    %98 = arith.mulf %93, %97 : vector<8x32xf32>
    %99 = vector.broadcast %79 : vector<1x32xf32> to vector<8x32xf32>
    %100 = arith.mulf %98, %99 : vector<8x32xf32>
    %101 = vector.broadcast %80 : vector<1x32xf32> to vector<8x32xf32>
    %102 = arith.addf %100, %101 : vector<8x32xf32>
    %c0_41 = arith.constant 0 : index
    %c0_42 = arith.constant 0 : index
    %c0_43 = arith.constant 0 : index
    %103 = vector.load %arg7[%c0_41, %c0_42, %c0_43] : memref<1x8x32xf32, #tpu.memory_space<vmem>>, vector<1x8x32xf32>
    %104 = vector.shape_cast %103 : vector<1x8x32xf32> to vector<8x32xf32>
    %105 = vector.shape_cast %102 : vector<8x32xf32> to vector<1x8x32xf32>
    tpu.vector_store %arg7[%c0_41, %c0_42, %c0_43], %105 {strides = array<i32>} : memref<1x8x32xf32, #tpu.memory_space<vmem>>, vector<1x8x32xf32>,
    return
  }
  func.func @transform_0(%arg0: i32) -> (i32, i32, i32) {
    %c0_i32 = arith.constant 0 : i32
    %c0_i32_0 = arith.constant 0 : i32
    %c0_i32_1 = arith.constant 0 : i32
    return %arg0, %c0_i32, %c0_i32_0 : i32, i32, i32
  }
  func.func @transform_1(%arg0: i32) -> (i32, i32, i32) {
    %c0_i32 = arith.constant 0 : i32
    %c0_i32_0 = arith.constant 0 : i32
    %c0_i32_1 = arith.constant 0 : i32
    return %arg0, %c0_i32, %c0_i32_0 : i32, i32, i32
  }
  func.func @transform_2(%arg0: i32) -> (i32, i32, i32) {
    %c0_i32 = arith.constant 0 : i32
    %c0_i32_0 = arith.constant 0 : i32
    %c0_i32_1 = arith.constant 0 : i32
    %c0_i32_2 = arith.constant 0 : i32
    return %c0_i32, %c0_i32_0, %c0_i32_1 : i32, i32, i32
  }
  func.func @transform_3(%arg0: i32) -> (i32, i32, i32) {
    %c0_i32 = arith.constant 0 : i32
    %c0_i32_0 = arith.constant 0 : i32
    %c0_i32_1 = arith.constant 0 : i32
    %c0_i32_2 = arith.constant 0 : i32
    return %c0_i32, %c0_i32_0, %c0_i32_1 : i32, i32, i32
  }
  func.func @transform_4(%arg0: i32) -> (i32, i32, i32) {
    %c0_i32 = arith.constant 0 : i32
    %c0_i32_0 = arith.constant 0 : i32
    %c0_i32_1 = arith.constant 0 : i32
    %c0_i32_2 = arith.constant 0 : i32
    return %c0_i32, %c0_i32_0, %c0_i32_1 : i32, i32, i32
  }
  func.func @transform_5(%arg0: i32) -> (i32, i32) {
    %c0_i32 = arith.constant 0 : i32
    %c0_i32_0 = arith.constant 0 : i32
    %c0_i32_1 = arith.constant 0 : i32
    return %c0_i32, %c0_i32_0 : i32, i32
  }
  func.func @transform_6(%arg0: i32) -> (i32, i32, i32) {
    %c0_i32 = arith.constant 0 : i32
    %c0_i32_0 = arith.constant 0 : i32
    %c0_i32_1 = arith.constant 0 : i32
    return %arg0, %c0_i32, %c0_i32_0 : i32, i32, i32
  }
  func.func @transform_7(%arg0: i32) -> (i32, i32, i32, i32) {
    %c0_i32 = arith.constant 0 : i32
    %c0_i32_0 = arith.constant 0 : i32
    %c0_i32_1 = arith.constant 0 : i32
    %c0_i32_2 = arith.constant 0 : i32
    return %arg0, %c0_i32, %c0_i32_0, %c0_i32_1 : i32, i32, i32, i32
  }
}

</mosaic_0001>

<bundles_post_ra>
// kernel: tpu_custom_call.1
= control target key start
LH: loop header
LB: loop body
LE: loop exit
PB: predicated region body
PF: predicated region fallthrough
CT: control target
= control target key end

     0   :  { %13 = vsyncpa [#allocation3], 0  ;;  %s2026_s0 = inlined_call_operand.vmem [shape: f32[2,8,32], index: 0, kind: input, shape index: {}]   ;;  %s2027_s1 = inlined_call_operand.vmem [shape: f32[2,1,8], index: 1, kind: input, shape index: {}]   ;;  %s2028_s2 = inlined_call_operand.vmem [shape: bf16[4,32,16], index: 2, kind: input, shape index: {}]   ;;  %s2029_s3 = inlined_call_operand.vmem [shape: bf16[4,32,16], index: 3, kind: input, shape index: {}]   ;;  %s2030_s4 = inlined_call_operand.vmem [shape: bf16[2,32,64], index: 4, kind: input, shape index: {}]   ;;  %s2031_s5 = inlined_call_operand.vmem [shape: f32[4,32], index: 5, kind: input, shape index: {}]   ;;  %s2032_s6 = inlined_call_operand.hbm [shape: f32[2,8,32], index: 6, kind: output, shape index: {0}]   ;;  %s2033_s7 = inlined_call_operand.hbm [shape: f32[2,2,8,8], index: 7, kind: output, shape index: {1}]  }
   0x1   :  { %15 = vsyncpa [#allocation3 + $0x1], 0 }
   0x2   :  { %16 = vsyncpa [#allocation5], 0 }
   0x3   :  { %18 = vsyncpa [#allocation5 + $0x1], 0  ;;  %s1724_s24 = smov 0   ;;  %s1726_s25 = smov 0  }
   0x4   :  { %s1728_s26 = smov 0   ;;  %s1730_s27 = smov 0  }
   0x5 LB: > { %s1745_s28 = sadd.s32 4294967295, %s1676_s27   ;;  %s1314_s29 = sadd.s32 4294967294, %s1676_s27   ;;  %s1676_s27 = sphi %s1730_s27, %s2039_s27   ;;  %s1672_s26 = sphi %s1728_s26, %s2038_s26   ;;  %s1668_s25 = sphi %s1726_s25, %s2037_s25   ;;  %s1664_s24 = sphi %s1724_s24, %s2036_s24  }
   0x6   : > { %s1749_s30 = sadd.s32 1, %s1676_s27   ;;  %s167_s8 = sadd.s32 1, %s1672_s26 }
   0x7   : > { %s164_s9 = ssub.s32 %s1676_s27, %s1749_s30  ;;  %p177_p0 = scmp.ne.s32.totalorder %s1672_s26, %s1668_s25 }
   0x8   : > { %p165_p1 = scmp.eq.s32.totalorder %s164_s9, 0  ;;  %p178_p2 = scmp.eq.s32.totalorder %s1745_s28, 1 }
   0x9   : > { %p183_p3 = scmp.ne.s32.totalorder %s1668_s25, %s1664_s24  ;;  %p184_p4 = scmp.eq.s32.totalorder %s1314_s29, 1 }
   0xa   : > { %s1760_s10 = scalar_select %p165_p1, %s1672_s26, %s167_s8  }
   0xb   : > { %p1762_p5 = por %p178_p2, %p177_p0  ;;  %p1766_p6 = por %p184_p4, %p183_p3 }
   0xc   : > { %p1317_p7 = scmp.ge.s32.totalorder %s1676_s27, 1  ;;  %p253_p8 = scmp.lt.s32.totalorder %s1676_s27, 3 }
   0xe   : > { %p254_p9 = pnand %p1317_p7, %p253_p8 }
   0xf   : > { %p292_p10 = scmp.lt.s32.totalorder (!%p254_p9), %s1745_s28, 1  ;;  %s1680_s20 = smov (!%p254_p9), [#allocation4]  }
  0x10   : > { %257 = sbr.rel (%p254_p9) target bundleno = 2172 (0x87c), region = 44 }
  0x15   : > { %v1554_v0 = vld [vmem:[%s2028_s2 + $0x8] sm:$0xff]   ;;  %v1678_v1 = vmov 0.0   ;;  %v1555_v2 = vld [vmem:[%s2028_s2 + $0x18] sm:$0xff]   ;;  %v1556_v3 = vld [vmem:[%s2028_s2] sm:$0xff]   ;;  %vm1679_vm0 = vmmov 0   ;;  %s1794_s21 = scalar_select %p292_p10, %s1745_s28, 1 }
  0x16   : > { %1402 = vmatprep.subr.bf16.mxu0 %v1678_v1  ;;  %1410 = vmatprep.subr.bf16.mxu1 %v1678_v1  ;;  %v1557_v4 = vld [vmem:[%s2028_s2 + $0x10] sm:$0xff]   ;;  %v1558_v5 = vld [vmem:[%s2028_s2 + $0x28] sm:$0xff]   ;;  %v1559_v6 = vld [vmem:[%s2028_s2 + $0x38] sm:$0xff]   ;;  %vm347_vm1 = vcmask 261120   ;;  %vm655_vm2 = vcmask 130048   ;;  %vm790_vm3 = vcmask 1043456  }
  0x17   : > { %1403 = vmatpush3.bf16.msra.mxu0 %v1554_v0  ;;  %1406 = vmatprep.mubr.msk.bf16.mxu0 %vm1679_vm0, %v1678_v1  ;;  %s1320_s22 = sshll.u32 %s1794_s21, 3  ;;  %v1560_v9 = vld [vmem:[%s2028_s2 + $0x20] sm:$0xff]   ;;  %v1561_v10 = vld [vmem:[%s2028_s2 + $0x30] sm:$0xff]   ;;  %v1562_v11 = vld [vmem:[%s2029_s3 + $0x8] sm:$0xff]   ;;  %s298_s17 = scalar_lea.vmem %s2027_s1, %s1794_s21  ;;  %vm758_vm4 = vcmask 64512   ;;  %vm1105_vm5 = vcmask 523264  }
  0x18   : > { %1411 = vmatpush3.bf16.msra.mxu1 %v1555_v2  ;;  %1404 = vmatprep.subr.bf16.mxu0 %v1678_v1  ;;  %s295_s13 = scalar_lea.vmem %s2026_s0, %s1320_s22  ;;  %v1563_v12 = vld [vmem:[%s2029_s3] sm:$0xff]   ;;  %v1564_v13 = vld [vmem:[%s2029_s3 + $0x18] sm:$0xff]   ;;  %v1565_v14 = vld [vmem:[%s2029_s3 + $0x10] sm:$0xff]   ;;  %s1877_s21 = sand.u32 1, %s1668_s25  }
  0x19   : > { %1412 = vmatprep.subr.bf16.mxu1 %v1678_v1  ;;  %1414 = vmatprep.mubr.msk.bf16.mxu1 %vm1679_vm0, %v1678_v1  ;;  %v1807_v7 = vld [vmem:[%s295_s13] sm:$0xff]  ;;  %s1319_s18 = sshll.u32 %s1877_s21, 4  ;;  %s1363_s13 = sshll.u32 %s1745_s28, 8 }
  0x1a   : > { %v302_v8 = vpack.c.bf16 %v1807_v7, %v1807_v7  ;;  %v1341_v51 = vld [vmem:[%s298_s17] ss:$0 sm:$0xff]  ;;  %s1887_s29 = scalar_lea.vmem [#allocation4], %s1319_s18  ;;  %s1959_s17 = scalar_lea.hbm %s2033_s7, %s1363_s13 }
  0x1b   : > { %1405 = vmatpush3.bf16.msra.mxu0 %v1556_v3  ;;  %s1211_s14 = sshll.u32 %s1887_s29, 4  ;;  %s1185_s18 = scalar_lea.sflag [#allocation5], %s1877_s21  ;;  %s1961_s14 = int_to_ptr.vmem [resolvable:$true] %s1211_s14 }
  0x1c   : > { %1413 = vmatpush3.bf16.msra.mxu1 %v1557_v4  ;;  %1418 = vmatprep.subr.bf16.mxu0 %v1678_v1  ;;  %s1586_s19 = scalar_lea.vmem %s1961_s14, 256  ;;  %s1590_s22 = sshll.u32 %s1680_s20, 4  ;;  %s1591_s22 = int_to_ptr.vmem [resolvable:$false] %s1590_s22 }
  0x1d   : > { %1426 = vmatprep.subr.bf16.mxu1 %v1678_v1  ;;  %p1587_p11 = scmp.ne.s32.totalorder %s1961_s14, %s1586_s19  ;;  %p1593_p0 = scmp.lt.s32.totalorder %s1961_s14, %s1591_s22 }
  0x1e   : > { %1407 = vmatmul.mubr.msk.bf16.vlgmr.msra.gmra.mxu0 %vm347_vm1, %v302_v8 }
  0x1f   : > { %1415 = vmatmul.mubr.msk.bf16.vlgmr.msra.gmra.mxu1 %vm347_vm1, %v302_v8  ;;  %1419 = vmatpush3.bf16.msra.mxu0 %v1558_v5  ;;  %p1588_p12 = pnand %p1587_p11, %p1762_p5 }
  0x20   : > { %1427 = vmatpush3.bf16.msra.mxu1 %v1559_v6  ;;  %1420 = vmatprep.subr.bf16.mxu0 %v1678_v1 }
  0x21   : > { %1428 = vmatprep.subr.bf16.mxu1 %v1678_v1  ;;  %1422 = vmatprep.mubr.msk.bf16.mxu0 %vm1679_vm0, %v1678_v1  ;;  %p1589_p13 = pneg %p1588_p12 }
  0x22   : > { %1430 = vmatprep.mubr.msk.bf16.mxu1 %vm1679_vm0, %v1678_v1 }
  0x23   : > { %1421 = vmatpush3.bf16.msra.mxu0 %v1560_v9 }
  0x24   : > { %1429 = vmatpush3.bf16.msra.mxu1 %v1561_v10  ;;  %1434 = vmatprep.subr.bf16.mxu0 %v1678_v1 }
  0x25   : > { %1442 = vmatprep.subr.bf16.mxu1 %v1678_v1 }
  0x26   : > { %1423 = vmatmul.mubr.msk.bf16.vlgmr.msra.gmra.mxu0 %vm347_vm1, %v302_v8 }
  0x27   : > { %1431 = vmatmul.mubr.msk.bf16.vlgmr.msra.gmra.mxu1 %vm347_vm1, %v302_v8  ;;  %1435 = vmatpush3.bf16.msra.mxu0 %v1562_v11 }
  0x28   : > { %1438 = vmatprep.mubr.msk.bf16.mxu0 %vm1679_vm0, %v1678_v1  ;;  %1436 = vmatprep.subr.bf16.mxu0 %v1678_v1 }
  0x29   : > { %1446 = vmatprep.mubr.msk.bf16.mxu1 %vm1679_vm0, %v1678_v1  ;;  %1443 = vmatpush3.bf16.msra.mxu1 %v1564_v13 }
  0x2a   : > { %1444 = vmatprep.subr.bf16.mxu1 %v1678_v1 }
  0x2b   : > { %1437 = vmatpush3.bf16.msra.mxu0 %v1563_v12 }
  0x2c   : > { %1450 = vmatprep.subr.bf16.mxu0 %v1678_v1 }
  0x2d   : > { %1445 = vmatpush3.bf16.msra.mxu1 %v1565_v14  ;;  %v1566_v14 = vld [vmem:[%s2029_s3 + $0x28] sm:$0xff]  }
  0x2e   : > { %1439 = vmatmul.mubr.msk.bf16.vlgmr.msra.gmra.mxu0 %vm347_vm1, %v302_v8  ;;  %1456 = vmatprep.subr.bf16.mxu1 %v1678_v1 }
  0x2f   : > { %1452 = vmatprep.mubr.msk.bf16.mxu0 %vm1679_vm0, %v1678_v1 }
  0x30   : > { %1447 = vmatmul.mubr.msk.bf16.vlgmr.msra.gmra.mxu1 %vm347_vm1, %v302_v8 }
  0x31   : > { %1458 = vmatprep.mubr.msk.bf16.mxu1 %vm1679_vm0, %v1678_v1 }
  0xde   : > { %v385_v15 = vpop.f32.mrf.mxu0 }
  0xdf   : > { %v437_v16 = vpop.f32.mrf.mxu1  ;;  %v651_v35 = vpack.c.bf16 %v385_v15, %v385_v15 }
  0xe0   : > { %v1408_v17 = vpop.f32.mrf.mxu0  ;;  %v652_v36 = vpack.c.bf16 %v437_v16, %v437_v16 }
  0xe1   : > { %v1416_v18 = vpop.f32.mrf.mxu1 }
  0xe2   : > { %v388_v19 = vpop.f32.mrf.mxu0  ;;  %v899_v18 = vsel %vm655_vm2, %v1566_v14, 0 }
  0xe3   : > { %v440_v20 = vpop.f32.mrf.mxu1  ;;  %v1567_v19 = vld [vmem:[%s2029_s3 + $0x38] sm:$0xff]  }
  0xe4   : > { %v1409_v21 = vpop.f32.mrf.mxu0 }
  0xe5   : > { %v1417_v22 = vpop.f32.mrf.mxu1 }
  0xe6   : > { %v489_v23 = vpop.f32.mrf.mxu0 }
  0xe7   : > { %v541_v24 = vpop.f32.mrf.mxu1  ;;  %v653_v25 = vpack.c.bf16 %v489_v23, %v489_v23  ;;  %v958_v23 = vsel %vm655_vm2, %v1567_v19, 0 }
  0xe8   : > { %v654_v26 = vpack.c.bf16 %v541_v24, %v541_v24  ;;  %v1424_v27 = vpop.f32.mrf.mxu0  ;;  %v1568_v24 = vld [vmem:[%s2029_s3 + $0x20] sm:$0xff]  }
  0xe9   : > { %v1432_v28 = vpop.f32.mrf.mxu1  ;;  %v660_v29 = vsel %vm655_vm2, %v653_v25, 0  ;;  %v896_v25 = vsel %vm655_vm2, %v1568_v24, 0 }
  0xea   : > { %v706_v30 = vsel %vm655_vm2, %v654_v26, 0  ;;  %v492_v31 = vpop.f32.mrf.mxu0  ;;  %1451 = vmatpush3.bf16.xpose.msra.mxu0 %v660_v29  ;;  %v1569_v26 = vld [vmem:[%s2029_s3 + $0x30] sm:$0xff]  }
  0xeb   : > { %v544_v32 = vpop.f32.mrf.mxu1  ;;  %1457 = vmatpush3.bf16.xpose.msra.mxu1 %v706_v30  ;;  %1462 = vmatprep.subr.bf16.mxu0 %v1678_v1  ;;  %v955_v27 = vsel %vm655_vm2, %v1569_v26, 0 }
  0xec   : > { %1468 = vmatprep.subr.bf16.mxu1 %v1678_v1  ;;  %v1425_v33 = vpop.f32.mrf.mxu0 }
  0xed   : > { %v1433_v34 = vpop.f32.mrf.mxu1 }
  0xee   : > { %v593_v37 = vpop.f32.mrf.mxu0 }
  0xef   : > { %v785_v38 = vpack.c.bf16 %v593_v37, %v593_v37 }
  0xf0   : > { %v1440_v39 = vpop.f32.mrf.mxu0  ;;  %v645_v42 = vpop.f32.mrf.mxu1 }
  0xf1   : > { %1453 = vmatmul.mubr.msk.bf16.vlgmr.msra.gmra.mxu0 %vm655_vm2, %v651_v35  ;;  %v792_v40 = vsel %vm790_vm3, %v785_v38, 0  ;;  %v786_v43 = vpack.c.bf16 %v645_v42, %v645_v42 }
  0xf2   : > { %1459 = vmatmul.mubr.msk.bf16.vlgmr.msra.gmra.mxu1 %vm655_vm2, %v652_v36  ;;  %1464 = vmatprep.mubr.msk.bf16.mxu0 %vm1679_vm0, %v1678_v1  ;;  %v596_v41 = vpop.f32.mrf.mxu0  ;;  %v1448_v45 = vpop.f32.mrf.mxu1 }
  0xf3   : > { %1470 = vmatprep.mubr.msk.bf16.mxu1 %vm1679_vm0, %v1678_v1  ;;  %1463 = vmatpush3.bf16.msra.mxu0 %v792_v40  ;;  %v838_v46 = vsel %vm790_vm3, %v786_v43, 0 }
  0xf4   : > { %1474 = vmatprep.subr.bf16.mxu0 %v1678_v1  ;;  %v1441_v44 = vpop.f32.mrf.mxu0  ;;  %v648_v47 = vpop.f32.mrf.mxu1  ;;  %1469 = vmatpush3.bf16.msra.mxu1 %v838_v46 }
  0xf5   : > { %1482 = vmatprep.subr.bf16.mxu1 %v1678_v1 }
  0xf6   : > { %v1449_v48 = vpop.f32.mrf.mxu1 }
 0x1b1   : > { %v696_v49 = vpop.f32.mrf.mxu0 }
 0x1b2   : > { %v742_v50 = vpop.f32.mrf.mxu1  ;;  %v748_v52 = vmul.f32 0.25, %v696_v49 }
 0x1b3   : > { %v749_v53 = vmul.f32 0.25, %v742_v50  ;;  %v1454_v54 = vpop.f32.mrf.mxu0 }
 0x1b4   : > { %v1460_v55 = vpop.f32.mrf.mxu1  ;;  %v756_v56 = vadd.f32 %v1341_v51, %v748_v52 }
 0x1b5   : > { %v699_v57 = vpop.f32.mrf.mxu0  ;;  %v757_v60 = vadd.f32 %v1341_v51, %v749_v53 }
 0x1b6   : > { %v745_v58 = vpop.f32.mrf.mxu1  ;;  %v759_v59 = vsel %vm758_vm4, %v756_v56, -inf  ;;  %v1572_v57 = vld [vmem:[%s2030_s4 + $0x18] sm:$0xff]  }
 0x1b7   : > { %760 = vmax.xlane.f32.xlu0 %v759_v59  ;;  %v1455_v62 = vpop.f32.mrf.mxu0  ;;  %v762_v63 = vsel %vm758_vm4, %v757_v60, -inf  ;;  %v1113_v58 = vsel %vm1105_vm5, %v1572_v57, 0  ;;  %v1573_v59 = vld [vmem:[%s2030_s4 + $0x10] sm:$0xff]  }
 0x1b8   : > { %v1461_v61 = vpop.f32.mrf.mxu1 }
 0x1bb   : > { %763 = vmax.xlane.f32.xlu0 %v762_v63 }
 0x240   : > { %v761_v0 = vpop.xlane.xlu0 %760 }
 0x241   : > { %v765_v2 = vsub.f32 %v756_v56, %v761_v0  ;;  %v1570_v56 = vld [vmem:[%s2030_s4 + $0x8] sm:$0xff]   ;;  %v1019_v0 = vlaneseq }
 0x243   : > { %v767_v3 = vmul.f32 1.442695, %v765_v2  ;;  %v1939_v2 = vshrl.u32 %v1019_v0, 7 }
 0x244   : > { %v764_v4 = vpop.xlane.xlu0 %763 }
 0x245   : > { %1574 = vpow2.f32 %v767_v3  ;;  %v766_v5 = vsub.f32 %v757_v60, %v764_v4  ;;  %v1110_v60 = vsel %vm1105_vm5, %v1573_v59, 0  ;;  %v1021_v3 = vsub.s32 0, %v1939_v2 }
 0x246   : > { %v1026_v4 = vsub.s32 1, %v1939_v2 }
 0x247   : > { %v769_v6 = vmul.f32 1.442695, %v766_v5 }
 0x249   : > { %1576 = vpow2.f32 %v769_v6 }
 0x252   : > { %v1575_v8 = vpop.eup %1574 }
 0x253   : > { %v771_v9 = vsel %vm758_vm4, %v1575_v8, 0.0 }
 0x254   : > { %772 = vadd.xlane.f32.xlu1 %v771_v9 }
 0x256   : > { %v1577_v10 = vpop.eup %1576 }
 0x257   : > { %v774_v11 = vsel %vm758_vm4, %v1577_v10, 0.0 }
 0x258   : > { %775 = vadd.xlane.f32.xlu1 %v774_v11 }
 0x2dd   : > { %v773_v12 = vpop.xlane.xlu1 %772 }
 0x2de   : > { %1578 = vrcp.f32 %v773_v12 }
 0x2e1   : > { %v776_v13 = vpop.xlane.xlu1 %775 }
 0x2e2   : > { %1580 = vrcp.f32 %v776_v13 }
 0x2eb   : > { %v1579_v15 = vpop.eup %1578 }
 0x2ec   : > { %v779_v16 = vmul.f32 %v1579_v15, %v1575_v8 }
 0x2ee   : > { %v783_v17 = vpack.c.bf16 %v779_v16, %v779_v16  ;;  %781 = vst.msk [vmem:[%s1887_s29] sm:$0xff] %vm758_vm4, %v779_v16 }
 0x2ef   : > { %v1581_v20 = vpop.eup %1580 }
 0x2f0   : > { %1465 = vmatmul.mubr.msk.bf16.vlgmr.msra.gmra.mxu0 %vm758_vm4, %v783_v17  ;;  %v780_v21 = vmul.f32 %v1581_v20, %v1577_v10 }
 0x2f1   : > { %1475 = vmatpush3.bf16.xpose.msra.mxu0 %v899_v18  ;;  %1478 = vmatprep.mubr.msk.bf16.mxu0 %vm1679_vm0, %v1678_v1 }
 0x2f2   : > { %v784_v22 = vpack.c.bf16 %v780_v21, %v780_v21  ;;  %1476 = vmatprep.subr.bf16.mxu0 %v1678_v1  ;;  %782 = vst.msk [vmem:[%s1887_s29 + $0x8] sm:$0xff] %vm758_vm4, %v780_v21  ;;  %s1592_s29 = scalar_lea.vmem %s1591_s22, 512 }
 0x2f3   : > { %p1594_p1 = scmp.lt.s32.totalorder %s1592_s29, %s1586_s19 }
 0x2f4   : > { %1471 = vmatmul.mubr.msk.bf16.vlgmr.msra.gmra.mxu1 %vm758_vm4, %v784_v22 }
 0x2f5   : > { %1483 = vmatpush3.bf16.xpose.msra.mxu1 %v958_v23  ;;  %1486 = vmatprep.mubr.msk.bf16.mxu1 %vm1679_vm0, %v1678_v1  ;;  %p1595_p2 = por %p1594_p1, %p1593_p0 }
 0x2f6   : > { %1484 = vmatprep.subr.bf16.mxu1 %v1678_v1 }
 0x2f7   : > { %p1596_p3 = pnand %p1595_p2, %p1589_p13 }
 0x2f9   : > { %1477 = vmatpush3.bf16.xpose.msra.mxu0 %v896_v25 }
 0x2fa   : > { %1490 = vmatprep.subr.bf16.mxu0 %v1678_v1 }
 0x2fd   : > { %1485 = vmatpush3.bf16.xpose.msra.mxu1 %v955_v27 }
 0x2fe   : > { %1498 = vmatprep.subr.bf16.mxu1 %v1678_v1 }
 0x3b0   : > { %v828_v28 = vpop.f32.mrf.mxu0 }
 0x3b1   : > { %v880_v29 = vpack.c.bf16 %v828_v28, %v828_v28 }
 0x3b2   : > { %v1466_v30 = vpop.f32.mrf.mxu0 }
 0x3b3   : > { %1479 = vmatmul.mubr.msk.bf16.vlgmr.msra.gmra.mxu0 %vm655_vm2, %v880_v29 }
 0x3b4   : > { %v831_v31 = vpop.f32.mrf.mxu0  ;;  %v874_v32 = vpop.f32.mrf.mxu1  ;;  %1494 = vmatprep.mubr.msk.bf16.mxu0 %vm1679_vm0, %v1678_v1  ;;  %1491 = vmatpush3.bf16.msra.mxu0 %v1570_v56 }
 0x3b5   : > { %v881_v33 = vpack.c.bf16 %v874_v32, %v874_v32  ;;  %1492 = vmatprep.subr.bf16.mxu0 %v1678_v1 }
 0x3b6   : > { %v1467_v34 = vpop.f32.mrf.mxu0  ;;  %v1472_v35 = vpop.f32.mrf.mxu1 }
 0x3b7   : > { %1487 = vmatmul.mubr.msk.bf16.vlgmr.msra.gmra.mxu1 %vm655_vm2, %v881_v33 }
 0x3b8   : > { %v877_v36 = vpop.f32.mrf.mxu1  ;;  %1502 = vmatprep.mubr.msk.bf16.mxu1 %vm1679_vm0, %v1678_v1  ;;  %1499 = vmatpush3.bf16.xpose.msra.mxu1 %v1113_v58 }
 0x3b9   : > { %1500 = vmatprep.subr.bf16.mxu1 %v1678_v1  ;;  %v1945_v1 = vld [vmem:[%s2031_s5] sm:$0xf] }
 0x3ba   : > { %v1473_v37 = vpop.f32.mrf.mxu1  ;;  %v1022_v5 = vrot.slane %v1945_v1, %v1021_v3  ;;  %v1027_v9 = vrot.slane %v1945_v1, %v1026_v4 }
 0x3c0   : > { %1501 = vmatpush3.bf16.xpose.msra.mxu1 %v1110_v60 }
 0x473   : > { %v935_v38 = vpop.f32.mrf.mxu0 }
 0x474   : > { %v1000_v42 = vsel %vm347_vm1, %v935_v38, 0.0 }
 0x475   : > { %v1480_v39 = vpop.f32.mrf.mxu0 }
 0x477   : > { %v938_v40 = vpop.f32.mrf.mxu0  ;;  %v994_v41 = vpop.f32.mrf.mxu1 }
 0x478   : > { %v1001_v43 = vsel %vm347_vm1, %v994_v41, 0.0 }
 0x479   : > { %v1002_v44 = vadd.f32 %v1001_v43, %v1000_v42  ;;  %v1481_v45 = vpop.f32.mrf.mxu0  ;;  %v1488_v46 = vpop.f32.mrf.mxu1 }
 0x47b   : > { %v997_v47 = vpop.f32.mrf.mxu1  ;;  %v1004_v48 = vadd.f32 %v1002_v44, %v1807_v7  ;;  %v1571_v7 = vld [vmem:[%s2030_s4] sm:$0xff]  }
 0x47c   : > { %1493 = vmatpush3.bf16.msra.mxu0 %v1571_v7 }
 0x47d   : > { %v1489_v49 = vpop.f32.mrf.mxu1  ;;  %v1005_v50 = vsel %vm347_vm1, %v1004_v48, 0.0 }
 0x47e   : > { %1006 = vadd.xlane.f32.xlu0 %v1005_v50 }
 0x507   : > { %v1007_v51 = vpop.xlane.xlu0 %1006 }
 0x508   : > { %v1009_v52 = vmul.f32 0.03125, %v1007_v51 }
 0x50a   : > { %v1010_v53 = vsub.f32 %v1004_v48, %v1009_v52 }
 0x50c   : > { %v1011_v54 = vmul.f32 %v1010_v53, %v1010_v53 }
 0x50e   : > { %v1012_v55 = vsel %vm347_vm1, %v1011_v54, 0.0 }
 0x50f   : > { %1013 = vadd.xlane.f32.xlu1 %v1012_v55 }
 0x598   : > { %v1014_v61 = vpop.xlane.xlu1 %1013 }
 0x599   : > { %v1015_v62 = vmul.f32 0.03125, %v1014_v61 }
 0x59b   : > { %v1016_v63 = vadd.f32 1e-05, %v1015_v62 }
 0x59d   : > { %1582 = vrsqrt.f32 %v1016_v63 }
 0x5aa   : > { %v1583_v6 = vpop.eup %1582 }
 0x5ab   : > { %v1018_v8 = vmul.f32 %v1583_v6, %v1010_v53 }
 0x5ad   : > { %v1023_v10 = vmul.f32 %v1022_v5, %v1018_v8 }
 0x5af   : > { %v1028_v11 = vadd.f32 %v1027_v9, %v1023_v10 }
 0x5b1   : > { %v1037_v12 = vpack.c.bf16 %v1028_v11, %v1028_v11 }
 0x5b3   : > { %1495 = vmatmul.mubr.msk.bf16.vlgmr.msra.gmra.mxu0 %vm347_vm1, %v1037_v12 }
 0x673   : > { %v1087_v13 = vpop.f32.mrf.mxu0 }
 0x674   : > { %v1093_v14 = vmax.f32 %v1087_v13, 0.0 }
 0x675   : > { %v1496_v15 = vpop.f32.mrf.mxu0 }
 0x676   : > { %v1094_v16 = vpack.c.bf16 %v1093_v14, %v1093_v14 }
 0x677   : > { %v1090_v17 = vpop.f32.mrf.mxu0 }
 0x678   : > { %1503 = vmatmul.mubr.msk.bf16.vlgmr.msra.gmra.mxu1 %vm1105_vm5, %v1094_v16 }
 0x679   : > { %v1497_v18 = vpop.f32.mrf.mxu0 }
 0x738   : > { %v1149_v19 = vpop.f32.mrf.mxu1 }
 0x739   : > { %v1150_v20 = vadd.f32 %v1149_v19, %v1028_v11 }
 0x73a   : > { %v1504_v21 = vpop.f32.mrf.mxu1 }
 0x73b   : > { %v1155_v22 = vsel %vm347_vm1, %v1150_v20, 0.0 }
 0x73c   : > { %1156 = vadd.xlane.f32.xlu0 %v1155_v22  ;;  %v1152_v23 = vpop.f32.mrf.mxu1 }
 0x73e   : > { %v1505_v24 = vpop.f32.mrf.mxu1 }
 0x7c5   : > { %v1157_v25 = vpop.xlane.xlu0 %1156 }
 0x7c6   : > { %v1158_v26 = vmul.f32 0.03125, %v1157_v25 }
 0x7c8   : > { %v1159_v27 = vsub.f32 %v1150_v20, %v1158_v26 }
 0x7ca   : > { %v1160_v28 = vmul.f32 %v1159_v27, %v1159_v27 }
 0x7cc   : > { %v1161_v29 = vsel %vm347_vm1, %v1160_v28, 0.0 }
 0x7cd   : > { %1162 = vadd.xlane.f32.xlu1 %v1161_v29 }
 0x7ce   : > { %1599 = shalt.err (!%p1596_p3)
}
 0x7cf   : > { %s1600_s23 = scalar_lea.hbm %s1959_s17, 256  ;;  %s1604_s13 = scalar_lea.hbm %s2033_s7, 512 }
 0x7d0   : > { %p1601_p4 = scmp.ne.s32.totalorder %s1959_s17, %s1600_s23  ;;  %p1605_p9 = scmp.lt.s32.totalorder %s1959_s17, %s2033_s7 }
 0x7d1   : > { %p1606_p10 = scmp.lt.s32.totalorder %s1604_s13, %s1600_s23 }
 0x7d2   : > { %p1602_p7 = pnand %p1601_p4, %p1762_p5 }
 0x7d3   : > { %p1607_p11 = por %p1606_p10, %p1605_p9 }
 0x7d4   : > { %p1603_p8 = pneg %p1602_p7 }
 0x7d6   : > { %p1608_p12 = pnand %p1607_p11, %p1603_p8 }
 0x7d8   : > { %1611 = shalt.err (!%p1608_p12)
}
 0x7d9   : > { %s1681_s19 = smov 128   ;;  %s1682_s20 = smov 8   ;;  %v1170_v33 = vsub.s32 2, %v1939_v2  ;;  %v1175_v34 = vsub.s32 3, %v1939_v2 }
 0x7da   : > { %1507 = dma.vmem_to_hbm [thread:$0]  (%p1762_p5), %s1961_s14, 256, %s1959_s17, %s1185_s18, %s1681_s19, %s1681_s19, %s1682_s20  }
 0x7db   : > { %s1318_s22 = sshll.u32 %s1877_s21, 3  ;;  %v1171_v35 = vrot.slane %v1945_v1, %v1170_v33  ;;  %v1176_v38 = vrot.slane %v1945_v1, %v1175_v34  ;;  %s1358_s29 = sshll.u32 %s1745_s28, 7 }
 0x7dc   : > { %s284_s23 = scalar_lea.vmem [#allocation2], %s1318_s22  ;;  %s1196_s8 = scalar_lea.hbm %s2032_s6, %s1358_s29 }
 0x7dd   : > { %s1198_s14 = sshll.u32 %s284_s23, 4  ;;  %s1180_s9 = scalar_lea.sflag [#allocation3], %s1877_s21  ;;  %s1199_s14 = int_to_ptr.vmem [resolvable:$true] %s1198_s14 }
 0x7de   : > { %s1612_s13 = scalar_lea.vmem %s1199_s14, 128  ;;  %s1683_s15 = smov [#allocation2]  }
 0x7df   : > { %p1613_p13 = scmp.ne.s32.totalorder %s1199_s14, %s1612_s13  ;;  %s1616_s16 = sshll.u32 %s1683_s15, 4  ;;  %s1617_s16 = int_to_ptr.vmem [resolvable:$false] %s1616_s16 }
 0x7e0   : > { %s1618_s28 = scalar_lea.vmem %s1617_s16, 256  ;;  %p1619_p2 = scmp.lt.s32.totalorder %s1199_s14, %s1617_s16 }
 0x7e1   : > { %p1614_p0 = pnand %p1613_p13, %p1762_p5  ;;  %p1620_p3 = scmp.lt.s32.totalorder %s1618_s28, %s1612_s13 }
 0x7e3   : > { %p1615_p1 = pneg %p1614_p0  ;;  %p1621_p4 = por %p1620_p3, %p1619_p2 }
 0x7e5   : > { %p1622_p7 = pnand %p1621_p4, %p1615_p1 }
 0x856   : > { %v1163_v30 = vpop.xlane.xlu1 %1162 }
 0x857   : > { %v1164_v31 = vmul.f32 0.03125, %v1163_v30 }
 0x859   : > { %v1165_v32 = vadd.f32 1e-05, %v1164_v31 }
 0x85b   : > { %1584 = vrsqrt.f32 %v1165_v32 }
 0x868   : > { %v1585_v36 = vpop.eup %1584 }
 0x869   : > { %v1167_v37 = vmul.f32 %v1585_v36, %v1159_v27 }
 0x86b   : > { %v1172_v39 = vmul.f32 %v1171_v35, %v1167_v37 }
 0x86d   : > { %v1177_v40 = vadd.f32 %v1176_v38, %v1172_v39 }
 0x86f   : > { %1178 = vst.msk [vmem:[%s284_s23] sm:$0xff] %vm347_vm1, %v1177_v40 }
 0x870   : > { %1625 = shalt.err (!%p1622_p7)
}
 0x871   : > { %s1626_s19 = scalar_lea.hbm %s1196_s8, 128  ;;  %s1630_s22 = scalar_lea.hbm %s2032_s6, 256 }
 0x872   : > { %p1627_p8 = scmp.ne.s32.totalorder %s1196_s8, %s1626_s19  ;;  %p1631_p11 = scmp.lt.s32.totalorder %s1196_s8, %s2032_s6 }
 0x873   : > { %p1632_p12 = scmp.lt.s32.totalorder %s1630_s22, %s1626_s19 }
 0x874   : > { %p1628_p9 = pnand %p1627_p8, %p1762_p5 }
 0x875   : > { %p1633_p13 = por %p1632_p12, %p1631_p11 }
 0x876   : > { %p1629_p10 = pneg %p1628_p9 }
 0x878   : > { %p1634_p0 = pnand %p1633_p13, %p1629_p10 }
 0x87a   : > { %1637 = shalt.err (!%p1634_p0)
}
 0x87b   : > { %1506 = dma.vmem_to_hbm [thread:$0]  (%p1762_p5), %s1199_s14, 128, %s1196_s8, %s1180_s9  }
 0x87c PF: > { %p1517_p1 = scmp.ge.s32.totalorder %s1676_s27, 2  ;;  %s1226_s17 = sand.u32 1, %s1664_s24  }
 0x87d   : > { %s1227_s18 = scalar_lea.sflag [#allocation3], %s1226_s17 }
 0x87e   : > { %p1511_p2 = pnand %p1517_p1, %p1766_p6 }
 0x880   : > { %p1512_p3 = pneg %p1511_p2 }
 0x882   : > { %1655 = dma.done.wait (%p1512_p3), %s1227_s18, 128  }
 0x883   : > { %1657 = vsyncadd (%p1512_p3), %s1227_s18, 4294967168  ;;  %s1236_s13 = scalar_lea.sflag [#allocation5], %s1226_s17 }
 0x884   : > { %1659 = dma.done.wait (%p1512_p3), %s1236_s13, 256  }
 0x885   : > { %1661 = vsyncadd (%p1512_p3), %s1236_s13, 4294967040  ;;  %p21_p5 = scmp.ge.s32.totalorder %s1749_s30, 4   ;;  %s2036_s24 = smov %s1668_s25 }
 0x886   : > { %s2037_s25 = smov %s1672_s26  ;;  %s2038_s26 = smov %s1760_s10 }
 0x887   : > { %s2039_s27 = smov %s1749_s30  ;;  %23 = sbr.rel (!%p21_p5) target bundleno = 5 (0x5), region = 99 }
 0x88c   :  { %1241 = vsyncpa [#allocation3], 1 }
 0x88d   :  { %1243 = vsyncpa [#allocation3 + $0x1], 1 }
 0x88e   :  { %1244 = vsyncpa [#allocation5], 1 }
 0x88f   :  { %1246 = vsyncpa [#allocation5 + $0x1], 1 }

</bundles_post_ra>
